<compile_context>
chip_gen: v5e
topology: v5e:2x2
jax: 0.10.0
libtpu: 0.0.40
codegen_flags: <defaults>
</compile_context>

<pallas_src>
import functools

import jax
import jax.numpy as jnp
from jax import lax
from jax.experimental import pallas as pl
from jax.experimental.pallas import tpu as pltpu

LN_EPS = 1e-5  # PyTorch nn.LayerNorm default


# --------------------------------------------------------------------------
# Hardware-aware sizing helpers
# --------------------------------------------------------------------------
def _round_up(x, m):
    return ((x + m - 1) // m) * m


def _round_down8(x):
    return max(8, (x // 8) * 8)


def _hw_budgets():
    """(vmem_limit_bytes, per-V-buffer budget, small_vmem_chip)."""
    phys = None
    try:
        phys = int(getattr(pltpu.get_tpu_info(), "vmem_capacity_bytes", 0)) or None
    except Exception:
        phys = None
    if phys is None:
        # Unknown generation: numbers that fit every chip (v7x has 64 MiB).
        return 48 << 20, 6 << 20, True
    if phys >= (128 << 20):                     # v5e / v6e
        return 96 << 20, 12 << 20, False
    # v7x: 64 MiB physical; leave headroom for compiler scratch.
    return min(phys * 3 // 4, 48 << 20), 6 << 20, True


def _pick_b_tile(B, b_tile, small_vmem):
    bt = min(B, b_tile)
    # On 2-TC / 64-MiB chips (v7x) ensure the "parallel" B axis has >= 2 tiles
    # so both TensorCores get work.
    if small_vmem and B >= 256:
        bt = min(bt, _round_up(pl.cdiv(B, 2), 128))
    if bt < B:
        bt = _round_down8(bt)
    return bt


def _pick_v_tile(num_v, d, itemsize, budget_bytes):
    """Lane-aligned V row-tile sized to ~budget_bytes per buffer."""
    vt = max(128, (budget_bytes // max(1, d * itemsize)) // 128 * 128)
    return min(num_v, vt)


def _pick_neg_b_tile(B, K, D, ts_itemsize, vmem_limit, b_tile):
    """Clamp bt so double-buffered (bt, K, D) + lhs/pred buffers fit VMEM."""
    budget = int(vmem_limit * 0.6)

    def fits(bt):
        return (2 * bt * K * D * ts_itemsize        # to_score, double buffered
                + 4 * bt * D * 4                    # lhs in + lhs out
                + 2 * bt * K * 4) <= budget         # predictions

    bt = min(B, b_tile)
    while bt > 8 and not fits(bt):
        bt = _round_down8(bt // 2)
    return bt


# --------------------------------------------------------------------------
# Kernel helpers
# --------------------------------------------------------------------------
def _layernorm(x, gamma, beta):
    mu = jnp.mean(x, axis=-1, keepdims=True)
    var = jnp.mean((x - mu) ** 2, axis=-1, keepdims=True)
    return (x - mu) * lax.rsqrt(var + LN_EPS) * gamma + beta


def _anchor_conv_body(lhs, g1, b1, fw, fb, g2, b2, rw, rb, mm_dtype):
    """norm1 -> fused(send@anchors) -> norm2 -> recv -> sin -> residual.
    Elementwise math in f32 (v5e has no bf16 VPU/EUP); matmul operands cast to
    mm_dtype with f32 accumulation."""
    x = _layernorm(lhs.astype(jnp.float32), g1, b1)
    r = jnp.dot(x.astype(mm_dtype), fw.astype(mm_dtype),
                preferred_element_type=jnp.float32) + fb
    r = _layernorm(r, g2, b2)
    a = jnp.dot(r.astype(mm_dtype), rw.astype(mm_dtype),
                preferred_element_type=jnp.float32) + rb
    return x + jnp.sin(a)


# --------------------------------------------------------------------------
# Fused kernels
# --------------------------------------------------------------------------
def _fused_full_kernel(lhs_ref, g1_ref, b1_ref, fw_ref, fb_ref,
                       g2_ref, b2_ref, rw_ref, rb_ref, v_ref,
                       lhs_out_ref, pred_ref, lhs_acc, *, mm_dtype):
    """AnchorConv once per B tile (cached in mm_dtype) + lhs @ V_emb.T streamed
    over num_V row-tiles.  Padded rows/cols produce garbage that is clipped on
    writeback (benign)."""
    @pl.when(pl.program_id(1) == 0)
    def _():
        out = _anchor_conv_body(lhs_ref[...], g1_ref[...], b1_ref[...],
                                fw_ref[...], fb_ref[...],
                                g2_ref[...], b2_ref[...],
                                rw_ref[...], rb_ref[...], mm_dtype)
        lhs_out_ref[...] = out.astype(lhs_out_ref.dtype)
        lhs_acc[...] = out.astype(lhs_acc.dtype)        # cast once per B tile

    # Contract feature dims of lhs [Bt, D] and V tile [Vt, D] directly; no
    # transposed copy of V_emb is ever materialized, and no per-step cast.
    pred_ref[...] = lax.dot_general(
        lhs_acc[...], v_ref[...],
        dimension_numbers=(((1,), (1,)), ((), ())),
        preferred_element_type=jnp.float32,
    ).astype(pred_ref.dtype)


def _fused_neg_kernel(lhs_ref, g1_ref, b1_ref, fw_ref, fb_ref,
                      g2_ref, b2_ref, rw_ref, rb_ref, ts_ref,
                      lhs_out_ref, pred_ref, *, mm_dtype):
    """AnchorConv + negative-sample scoring via VPU multiply + lane reduction
    (an M=1 batched MXU matmul would waste the 256-wide MXU on v6e/v7x and
    serialize behind the AnchorConv MXU work)."""
    out = _anchor_conv_body(lhs_ref[...], g1_ref[...], b1_ref[...],
                            fw_ref[...], fb_ref[...],
                            g2_ref[...], b2_ref[...],
                            rw_ref[...], rb_ref[...], mm_dtype)
    lhs_out_ref[...] = out.astype(lhs_out_ref.dtype)

    ts = ts_ref[...].astype(jnp.float32)                # [Bt, K, D]
    pred = jnp.sum(out[:, None, :] * ts, axis=-1)       # [Bt, K]
    pred_ref[...] = pred.astype(pred_ref.dtype)


# --------------------------------------------------------------------------
# pallas_call wrappers
# --------------------------------------------------------------------------
def _param_inputs(params):
    # Exact algebraic fold (no nonlinearity between send and anchors):
    #   (x @ send_w + send_b) @ anchor_emb_T
    #     == x @ (send_w @ anchor_emb_T) + (send_b @ anchor_emb_T)
    # Tiny one-off matmuls; under jit / a training loop precompute them once.
    fused_w = params["send_w"] @ params["anchor_emb_T"]                  # [dim, n_anchor]
    fused_b = params["send_b"].reshape(1, -1) @ params["anchor_emb_T"]   # [1, n_anchor]
    return (
        params["ln1_g"].reshape(1, -1), params["ln1_b"].reshape(1, -1),
        fused_w, fused_b,
        params["ln2_g"].reshape(1, -1), params["ln2_b"].reshape(1, -1),
        params["recv_w"], params["recv_b"].reshape(1, -1),
    )


def anchor_conv_full_score(params, lhs0, *, matmul_dtype=jnp.float32,
                           b_tile=256, preds_dtype=jnp.float32):
    B, D = lhs0.shape
    v_emb = params["V_emb"]
    if v_emb.dtype != jnp.dtype(matmul_dtype):
        # Halve the streamed bytes on the HBM-bound V axis.  For training
        # loops, store V_emb natively in matmul_dtype (or hoist under jit).
        v_emb = v_emb.astype(matmul_dtype)
    num_V = v_emb.shape[0]

    vmem_limit, v_budget, small_vmem = _hw_budgets()
    bt = _pick_b_tile(B, b_tile, small_vmem)
    vt = _pick_v_tile(num_V, D, v_emb.dtype.itemsize, v_budget)
    grid = (pl.cdiv(B, bt), pl.cdiv(num_V, vt))

    param_in = _param_inputs(params)
    const_specs = [pl.BlockSpec(p.shape, lambda b, v: (0, 0)) for p in param_in]
    in_specs = ([pl.BlockSpec((bt, D), lambda b, v: (b, 0))]
                + const_specs
                + [pl.BlockSpec((vt, D), lambda b, v: (v, 0))])
    out_specs = (pl.BlockSpec((bt, D), lambda b, v: (b, 0)),   # resident over v
                 pl.BlockSpec((bt, vt), lambda b, v: (b, v)))
    out_shape = (jax.ShapeDtypeStruct((B, D), lhs0.dtype),
                 jax.ShapeDtypeStruct((B, num_V), preds_dtype))

    lhs_out, preds = pl.pallas_call(
        functools.partial(_fused_full_kernel, mm_dtype=matmul_dtype),
        out_shape=out_shape,
        grid=grid,
        in_specs=in_specs,
        out_specs=out_specs,
        scratch_shapes=[pltpu.VMEM((bt, D), matmul_dtype)],
        compiler_params=pltpu.CompilerParams(
            dimension_semantics=("parallel", "arbitrary"),
            vmem_limit_bytes=vmem_limit),
    )(lhs0, *param_in, v_emb)
    return lhs_out, preds


def anchor_conv_neg_score(params, lhs0, to_score, *, matmul_dtype=jnp.float32,
                          b_tile=256):
    B, D = lhs0.shape
    K = to_score.shape[1]
    if to_score.dtype != jnp.dtype(matmul_dtype):
        to_score = to_score.astype(matmul_dtype)        # halve the streamed bytes

    vmem_limit, _, _ = _hw_budgets()
    bt = _pick_neg_b_tile(B, K, D, to_score.dtype.itemsize, vmem_limit, b_tile)
    grid = (pl.cdiv(B, bt),)

    param_in = _param_inputs(params)
    const_specs = [pl.BlockSpec(p.shape, lambda b: (0, 0)) for p in param_in]
    in_specs = ([pl.BlockSpec((bt, D), lambda b: (b, 0))]
                + const_specs
                + [pl.BlockSpec((bt, K, D), lambda b: (b, 0, 0))])
    out_specs = (pl.BlockSpec((bt, D), lambda b: (b, 0)),
                 pl.BlockSpec((bt, K), lambda b: (b, 0)))
    out_shape = (jax.ShapeDtypeStruct((B, D), lhs0.dtype),
                 jax.ShapeDtypeStruct((B, K), jnp.float32))

    lhs_out, preds = pl.pallas_call(
        functools.partial(_fused_neg_kernel, mm_dtype=matmul_dtype),
        out_shape=out_shape,
        grid=grid,
        in_specs=in_specs,
        out_specs=out_specs,
        compiler_params=pltpu.CompilerParams(
            dimension_semantics=("parallel",),
            vmem_limit_bytes=vmem_limit),
    )(lhs0, *param_in, to_score)
    return lhs_out, preds


# --------------------------------------------------------------------------
# BGE_Encoder forward
# --------------------------------------------------------------------------
def bge_encoder_forward(params, idx_U, pos_idx_V, neg_idx_V, *,
                        matmul_dtype=jnp.float32, preds_dtype=jnp.float32):
    lhs0 = params["U_emb"][idx_U]            # embedding gather (glue, plain JAX)
    rhs = params["V_emb"][pos_idx_V]
    if neg_idx_V is None:
        lhs, predictions = anchor_conv_full_score(
            params, lhs0, matmul_dtype=matmul_dtype, preds_dtype=preds_dtype)
    else:
        # TODO(synk): gather V_emb rows in-kernel (scalar-prefetched indices +
        # per-row DMA from memory_space=pl.ANY V_emb) to avoid materializing
        # to_score in HBM — top remaining neg-path lever.
        neg_rhs = params["V_emb"][neg_idx_V]                 # [B, Nneg, dim]
        to_score = jnp.concatenate([rhs[:, None, :], neg_rhs], axis=1)
        lhs, predictions = anchor_conv_neg_score(
            params, lhs0, to_score, matmul_dtype=matmul_dtype)
    return predictions, (lhs, rhs)


# --------------------------------------------------------------------------
# Deterministic parameter init (mimics the torch inits; synthetic, no checkpoint)
# --------------------------------------------------------------------------
def init_params(key, dim, num_U, num_V, n_anchor, dim_anchor):
    ks = jax.random.split(key, 8)

    def xavier_normal(k, shape):     # shape = (fan_out, fan_in) torch convention
        std = (2.0 / (shape[0] + shape[1])) ** 0.5
        return std * jax.random.normal(k, shape, jnp.float32)

    def xavier_uniform(k, shape):
        bound = (6.0 / (shape[0] + shape[1])) ** 0.5
        return jax.random.uniform(k, shape, jnp.float32, -bound, bound)

    # torch Linear weight is [out, in]; we store the transposed [in, out] form.
    send_w_t = xavier_uniform(ks[2], (dim_anchor, dim))      # Linear(dim, dim_anchor)
    recv_w_t = xavier_uniform(ks[3], (dim, n_anchor))        # Linear(n_anchor, dim)
    anchor_emb = xavier_uniform(ks[4], (n_anchor, dim_anchor))

    return {
        "U_emb": xavier_normal(ks[0], (num_U, dim)),
        "V_emb": xavier_normal(ks[1], (num_V, dim)),
        "ln1_g": jnp.ones((dim,), jnp.float32),
        "ln1_b": jnp.zeros((dim,), jnp.float32),
        "send_w": send_w_t.T,                                # [dim, dim_anchor]
        "send_b": jnp.zeros((dim_anchor,), jnp.float32),
        "anchor_emb_T": anchor_emb.T,                        # [dim_anchor, n_anchor]
        "ln2_g": jnp.ones((n_anchor,), jnp.float32),
        "ln2_b": jnp.zeros((n_anchor,), jnp.float32),
        "recv_w": recv_w_t.T,                                # [n_anchor, dim]
        "recv_b": jnp.zeros((dim,), jnp.float32),
    }


# --------------------------------------------------------------------------
# Pure-JAX reference (literal translation of the PyTorch module, un-fused)
# --------------------------------------------------------------------------
def reference_forward(params, idx_U, pos_idx_V, neg_idx_V):
    def ln(x, g, b):
        mu = x.mean(-1, keepdims=True)
        var = ((x - mu) ** 2).mean(-1, keepdims=True)
        return (x - mu) / jnp.sqrt(var + LN_EPS) * g + b

    lhs = params["U_emb"][idx_U]
    rhs = params["V_emb"][pos_idx_V]
    x = ln(lhs, params["ln1_g"], params["ln1_b"])
    s = x @ params["send_w"] + params["send_b"]
    r = s @ params["anchor_emb_T"]
    r = ln(r, params["ln2_g"], params["ln2_b"])
    a = r @ params["recv_w"] + params["recv_b"]
    lhs_out = x + jnp.sin(a)
    if neg_idx_V is None:
        preds = lhs_out @ params["V_emb"].T
    else:
        neg_rhs = params["V_emb"][neg_idx_V]
        to_score = jnp.concatenate([rhs[:, None, :], neg_rhs], axis=1)
        preds = (lhs_out[:, None, :] * to_score).sum(-1)
    return preds, (lhs_out, rhs)


# --------------------------------------------------------------------------
if __name__ == "__main__":
    dim, num_U, num_V = 32, 64, 96
    n_anchor, dim_anchor = 16, 8
    B, n_neg = 8, 4

    key = jax.random.PRNGKey(0)
    kp, k1, k2, k3 = jax.random.split(key, 4)
    params = init_params(kp, dim, num_U, num_V, n_anchor, dim_anchor)

    idx_U = jax.random.randint(k1, (B,), 0, num_U)
    pos_idx_V = jax.random.randint(k2, (B,), 0, num_V)
    neg_idx_V = jax.random.randint(k3, (B, n_neg), 0, num_V)

    # --- f32 matmul-operand path (parity with the f32 reference) ---
    preds, (lhs, rhs) = bge_encoder_forward(params, idx_U, pos_idx_V, neg_idx_V)
    preds_full, _ = bge_encoder_forward(params, idx_U, pos_idx_V, None)
    jax.block_until_ready((preds, lhs, rhs, preds_full))

    ref_preds, (ref_lhs, ref_rhs) = reference_forward(params, idx_U, pos_idx_V, neg_idx_V)
    ref_full, _ = reference_forward(params, idx_U, pos_idx_V, None)
    assert jnp.allclose(preds, ref_preds, atol=1e-4, rtol=1e-4)
    assert jnp.allclose(lhs, ref_lhs, atol=1e-4, rtol=1e-4)
    assert jnp.allclose(rhs, ref_rhs, atol=1e-4, rtol=1e-4)
    assert jnp.allclose(preds_full, ref_full, atol=1e-4, rtol=1e-4)

    # --- bf16 stream / matmul path (recommended on all generations; looser tol) ---
    preds_bf, (lhs_bf, _) = bge_encoder_forward(
        params, idx_U, pos_idx_V, neg_idx_V, matmul_dtype=jnp.bfloat16)
    preds_full_bf, _ = bge_encoder_forward(
        params, idx_U, pos_idx_V, None,
        matmul_dtype=jnp.bfloat16, preds_dtype=jnp.bfloat16)
    jax.block_until_ready((preds_bf, lhs_bf, preds_full_bf))
    assert jnp.allclose(preds_bf, ref_preds, atol=2e-1, rtol=1e-1)
    assert jnp.allclose(preds_full_bf, ref_full, atol=2e-1, rtol=1e-1)
    assert jnp.allclose(lhs_bf, ref_lhs, atol=2e-1, rtol=1e-1)

    print("KERNEL_OK")
</pallas_src>

<mosaic_0001>
module attributes {stable_mosaic.version = 11 : i64} {
  func.func @_fused_neg_kernel(%arg0: i32, %arg1: memref<8x32xf32, #tpu.memory_space<vmem>>, %arg2: memref<1x32xf32, #tpu.memory_space<vmem>>, %arg3: memref<1x32xf32, #tpu.memory_space<vmem>>, %arg4: memref<32x16xf32, #tpu.memory_space<vmem>>, %arg5: memref<1x16xf32, #tpu.memory_space<vmem>>, %arg6: memref<1x16xf32, #tpu.memory_space<vmem>>, %arg7: memref<1x16xf32, #tpu.memory_space<vmem>>, %arg8: memref<16x32xf32, #tpu.memory_space<vmem>>, %arg9: memref<1x32xf32, #tpu.memory_space<vmem>>, %arg10: memref<8x5x32xf32, #tpu.memory_space<vmem>>, %arg11: memref<8x32xf32, #tpu.memory_space<vmem>>, %arg12: memref<8x5xf32, #tpu.memory_space<vmem>>) attributes {dimension_semantics = [#tpu.dimension_semantics<parallel>], iteration_bounds = array<i64: 1>, scalar_prefetch = 0 : i64, scratch_operands = 0 : i64, tpu.core_type = #tpu.core_type<tc>, window_params = [{transform_indices = @transform_0, window_bounds = array<i64: 8, 32>}, {pipeline_mode = #tpu.pipeline_mode<synchronous>, transform_indices = @transform_1, window_bounds = array<i64: 1, 32>}, {pipeline_mode = #tpu.pipeline_mode<synchronous>, transform_indices = @transform_2, window_bounds = array<i64: 1, 32>}, {pipeline_mode = #tpu.pipeline_mode<synchronous>, transform_indices = @transform_3, window_bounds = array<i64: 32, 16>}, {pipeline_mode = #tpu.pipeline_mode<synchronous>, transform_indices = @transform_4, window_bounds = array<i64: 1, 16>}, {pipeline_mode = #tpu.pipeline_mode<synchronous>, transform_indices = @transform_5, window_bounds = array<i64: 1, 16>}, {pipeline_mode = #tpu.pipeline_mode<synchronous>, transform_indices = @transform_6, window_bounds = array<i64: 1, 16>}, {pipeline_mode = #tpu.pipeline_mode<synchronous>, transform_indices = @transform_7, window_bounds = array<i64: 16, 32>}, {pipeline_mode = #tpu.pipeline_mode<synchronous>, transform_indices = @transform_8, window_bounds = array<i64: 1, 32>}, {transform_indices = @transform_9, window_bounds = array<i64: 8, 5, 32>}, {transform_indices = @transform_10, window_bounds = array<i64: 8, 32>}, {transform_indices = @transform_11, window_bounds = array<i64: 8, 5>}]} {
    %c0 = arith.constant 0 : index
    %c0_0 = arith.constant 0 : index
    %0 = vector.load %arg1[%c0, %c0_0] : memref<8x32xf32, #tpu.memory_space<vmem>>, vector<8x32xf32>
    %c0_1 = arith.constant 0 : index
    %c0_2 = arith.constant 0 : index
    %1 = vector.load %arg2[%c0_1, %c0_2] : memref<1x32xf32, #tpu.memory_space<vmem>>, vector<1x32xf32>
    %c0_3 = arith.constant 0 : index
    %c0_4 = arith.constant 0 : index
    %2 = vector.load %arg3[%c0_3, %c0_4] : memref<1x32xf32, #tpu.memory_space<vmem>>, vector<1x32xf32>
    %c0_5 = arith.constant 0 : index
    %c0_6 = arith.constant 0 : index
    %3 = vector.load %arg4[%c0_5, %c0_6] : memref<32x16xf32, #tpu.memory_space<vmem>>, vector<32x16xf32>
    %c0_7 = arith.constant 0 : index
    %c0_8 = arith.constant 0 : index
    %4 = vector.load %arg5[%c0_7, %c0_8] : memref<1x16xf32, #tpu.memory_space<vmem>>, vector<1x16xf32>
    %c0_9 = arith.constant 0 : index
    %c0_10 = arith.constant 0 : index
    %5 = vector.load %arg6[%c0_9, %c0_10] : memref<1x16xf32, #tpu.memory_space<vmem>>, vector<1x16xf32>
    %c0_11 = arith.constant 0 : index
    %c0_12 = arith.constant 0 : index
    %6 = vector.load %arg7[%c0_11, %c0_12] : memref<1x16xf32, #tpu.memory_space<vmem>>, vector<1x16xf32>
    %c0_13 = arith.constant 0 : index
    %c0_14 = arith.constant 0 : index
    %7 = vector.load %arg8[%c0_13, %c0_14] : memref<16x32xf32, #tpu.memory_space<vmem>>, vector<16x32xf32>
    %c0_15 = arith.constant 0 : index
    %c0_16 = arith.constant 0 : index
    %8 = vector.load %arg9[%c0_15, %c0_16] : memref<1x32xf32, #tpu.memory_space<vmem>>, vector<1x32xf32>
    %cst = arith.constant dense<0.000000e+00> : vector<8xf32>
    %9 = vector.multi_reduction <add>, %0, %cst [1] : vector<8x32xf32> to vector<8xf32>
    %10 = vector.shape_cast %9 : vector<8xf32> to vector<8x1xf32>
    %cst_17 = arith.constant 3.200000e+01 : f32
    %11 = vector.broadcast %cst_17 : f32 to vector<8x1xf32>
    %12 = arith.divf %10, %11 : vector<8x1xf32>
    %13 = vector.broadcast %12 : vector<8x1xf32> to vector<8x32xf32>
    %14 = arith.subf %0, %13 : vector<8x32xf32>
    %15 = arith.mulf %14, %14 : vector<8x32xf32>
    %cst_18 = arith.constant dense<0.000000e+00> : vector<8xf32>
    %16 = vector.multi_reduction <add>, %15, %cst_18 [1] : vector<8x32xf32> to vector<8xf32>
    %17 = vector.shape_cast %16 : vector<8xf32> to vector<8x1xf32>
    %cst_19 = arith.constant 3.200000e+01 : f32
    %18 = vector.broadcast %cst_19 : f32 to vector<8x1xf32>
    %19 = arith.divf %17, %18 : vector<8x1xf32>
    %20 = vector.broadcast %12 : vector<8x1xf32> to vector<8x32xf32>
    %21 = arith.subf %0, %20 : vector<8x32xf32>
    %cst_20 = arith.constant 9.99999974E-6 : f32
    %22 = vector.broadcast %cst_20 : f32 to vector<8x1xf32>
    %23 = arith.addf %19, %22 : vector<8x1xf32>
    %24 = math.rsqrt %23 : vector<8x1xf32>
    %25 = vector.broadcast %24 : vector<8x1xf32> to vector<8x32xf32>
    %26 = arith.mulf %21, %25 : vector<8x32xf32>
    %27 = vector.broadcast %1 : vector<1x32xf32> to vector<8x32xf32>
    %28 = arith.mulf %26, %27 : vector<8x32xf32>
    %29 = vector.broadcast %2 : vector<1x32xf32> to vector<8x32xf32>
    %30 = arith.addf %28, %29 : vector<8x32xf32>
    %cst_21 = arith.constant dense<0.000000e+00> : vector<8x16xf32>
    %31 = tpu.matmul %30, %3, %cst_21 {dimension_numbers = #tpu.dot_dimension_numbers<[1], [0], [0], [1], [0, 0, 1, 1], [], []>} : vector<8x32xf32>, vector<32x16xf32>, vector<8x16xf32> -> vector<8x16xf32>
    %32 = vector.broadcast %4 : vector<1x16xf32> to vector<8x16xf32>
    %33 = arith.addf %31, %32 : vector<8x16xf32>
    %cst_22 = arith.constant dense<0.000000e+00> : vector<8xf32>
    %34 = vector.multi_reduction <add>, %33, %cst_22 [1] : vector<8x16xf32> to vector<8xf32>
    %35 = vector.shape_cast %34 : vector<8xf32> to vector<8x1xf32>
    %cst_23 = arith.constant 1.600000e+01 : f32
    %36 = vector.broadcast %cst_23 : f32 to vector<8x1xf32>
    %37 = arith.divf %35, %36 : vector<8x1xf32>
    %38 = vector.broadcast %37 : vector<8x1xf32> to vector<8x16xf32>
    %39 = arith.subf %33, %38 : vector<8x16xf32>
    %40 = arith.mulf %39, %39 : vector<8x16xf32>
    %cst_24 = arith.constant dense<0.000000e+00> : vector<8xf32>
    %41 = vector.multi_reduction <add>, %40, %cst_24 [1] : vector<8x16xf32> to vector<8xf32>
    %42 = vector.shape_cast %41 : vector<8xf32> to vector<8x1xf32>
    %cst_25 = arith.constant 1.600000e+01 : f32
    %43 = vector.broadcast %cst_25 : f32 to vector<8x1xf32>
    %44 = arith.divf %42, %43 : vector<8x1xf32>
    %45 = vector.broadcast %37 : vector<8x1xf32> to vector<8x16xf32>
    %46 = arith.subf %33, %45 : vector<8x16xf32>
    %cst_26 = arith.constant 9.99999974E-6 : f32
    %47 = vector.broadcast %cst_26 : f32 to vector<8x1xf32>
    %48 = arith.addf %44, %47 : vector<8x1xf32>
    %49 = math.rsqrt %48 : vector<8x1xf32>
    %50 = vector.broadcast %49 : vector<8x1xf32> to vector<8x16xf32>
    %51 = arith.mulf %46, %50 : vector<8x16xf32>
    %52 = vector.broadcast %5 : vector<1x16xf32> to vector<8x16xf32>
    %53 = arith.mulf %51, %52 : vector<8x16xf32>
    %54 = vector.broadcast %6 : vector<1x16xf32> to vector<8x16xf32>
    %55 = arith.addf %53, %54 : vector<8x16xf32>
    %cst_27 = arith.constant dense<0.000000e+00> : vector<8x32xf32>
    %56 = tpu.matmul %55, %7, %cst_27 {dimension_numbers = #tpu.dot_dimension_numbers<[1], [0], [0], [1], [0, 0, 1, 1], [], []>} : vector<8x16xf32>, vector<16x32xf32>, vector<8x32xf32> -> vector<8x32xf32>
    %57 = vector.broadcast %8 : vector<1x32xf32> to vector<8x32xf32>
    %58 = arith.addf %56, %57 : vector<8x32xf32>
    %59 = math.sin %58 : vector<8x32xf32>
    %60 = arith.addf %30, %59 : vector<8x32xf32>
    %c0_28 = arith.constant 0 : index
    %c0_29 = arith.constant 0 : index
    %61 = vector.load %arg11[%c0_28, %c0_29] : memref<8x32xf32, #tpu.memory_space<vmem>>, vector<8x32xf32>
    tpu.vector_store %arg11[%c0_28, %c0_29], %60 {strides = array<i32>} : memref<8x32xf32, #tpu.memory_space<vmem>>, vector<8x32xf32>,
    %c0_30 = arith.constant 0 : index
    %c0_31 = arith.constant 0 : index
    %c0_32 = arith.constant 0 : index
    %62 = vector.load %arg10[%c0_30, %c0_31, %c0_32] : memref<8x5x32xf32, #tpu.memory_space<vmem>>, vector<8x5x32xf32>
    %63 = vector.shape_cast %60 : vector<8x32xf32> to vector<8x1x32xf32>
    %64 = vector.broadcast %63 : vector<8x1x32xf32> to vector<8x5x32xf32>
    %65 = arith.mulf %64, %62 : vector<8x5x32xf32>
    %cst_33 = arith.constant dense<0.000000e+00> : vector<8x5xf32>
    %66 = vector.multi_reduction <add>, %65, %cst_33 [2] : vector<8x5x32xf32> to vector<8x5xf32>
    %c0_34 = arith.constant 0 : index
    %c0_35 = arith.constant 0 : index
    %67 = vector.load %arg12[%c0_34, %c0_35] : memref<8x5xf32, #tpu.memory_space<vmem>>, vector<8x5xf32>
    tpu.vector_store %arg12[%c0_34, %c0_35], %66 {strides = array<i32>} : memref<8x5xf32, #tpu.memory_space<vmem>>, vector<8x5xf32>,
    return
  }
  func.func @transform_0(%arg0: i32) -> (i32, i32) {
    %c0_i32 = arith.constant 0 : i32
    %c0_i32_0 = arith.constant 0 : i32
    return %arg0, %c0_i32 : i32, i32
  }
  func.func @transform_1(%arg0: i32) -> (i32, i32) {
    %c0_i32 = arith.constant 0 : i32
    %c0_i32_0 = arith.constant 0 : i32
    %c0_i32_1 = arith.constant 0 : i32
    return %c0_i32, %c0_i32_0 : i32, i32
  }
  func.func @transform_2(%arg0: i32) -> (i32, i32) {
    %c0_i32 = arith.constant 0 : i32
    %c0_i32_0 = arith.constant 0 : i32
    %c0_i32_1 = arith.constant 0 : i32
    return %c0_i32, %c0_i32_0 : i32, i32
  }
  func.func @transform_3(%arg0: i32) -> (i32, i32) {
    %c0_i32 = arith.constant 0 : i32
    %c0_i32_0 = arith.constant 0 : i32
    %c0_i32_1 = arith.constant 0 : i32
    return %c0_i32, %c0_i32_0 : i32, i32
  }
  func.func @transform_4(%arg0: i32) -> (i32, i32) {
    %c0_i32 = arith.constant 0 : i32
    %c0_i32_0 = arith.constant 0 : i32
    %c0_i32_1 = arith.constant 0 : i32
    return %c0_i32, %c0_i32_0 : i32, i32
  }
  func.func @transform_5(%arg0: i32) -> (i32, i32) {
    %c0_i32 = arith.constant 0 : i32
    %c0_i32_0 = arith.constant 0 : i32
    %c0_i32_1 = arith.constant 0 : i32
    return %c0_i32, %c0_i32_0 : i32, i32
  }
  func.func @transform_6(%arg0: i32) -> (i32, i32) {
    %c0_i32 = arith.constant 0 : i32
    %c0_i32_0 = arith.constant 0 : i32
    %c0_i32_1 = arith.constant 0 : i32
    return %c0_i32, %c0_i32_0 : i32, i32
  }
  func.func @transform_7(%arg0: i32) -> (i32, i32) {
    %c0_i32 = arith.constant 0 : i32
    %c0_i32_0 = arith.constant 0 : i32
    %c0_i32_1 = arith.constant 0 : i32
    return %c0_i32, %c0_i32_0 : i32, i32
  }
  func.func @transform_8(%arg0: i32) -> (i32, i32) {
    %c0_i32 = arith.constant 0 : i32
    %c0_i32_0 = arith.constant 0 : i32
    %c0_i32_1 = arith.constant 0 : i32
    return %c0_i32, %c0_i32_0 : i32, i32
  }
  func.func @transform_9(%arg0: i32) -> (i32, i32, i32) {
    %c0_i32 = arith.constant 0 : i32
    %c0_i32_0 = arith.constant 0 : i32
    %c0_i32_1 = arith.constant 0 : i32
    return %arg0, %c0_i32, %c0_i32_0 : i32, i32, i32
  }
  func.func @transform_10(%arg0: i32) -> (i32, i32) {
    %c0_i32 = arith.constant 0 : i32
    %c0_i32_0 = arith.constant 0 : i32
    return %arg0, %c0_i32 : i32, i32
  }
  func.func @transform_11(%arg0: i32) -> (i32, i32) {
    %c0_i32 = arith.constant 0 : i32
    %c0_i32_0 = arith.constant 0 : i32
    return %arg0, %c0_i32 : i32, i32
  }
}

</mosaic_0001>

<bundles_post_ra>
// kernel: tpu_custom_call.1
= control target key start
LH: loop header
LB: loop body
LE: loop exit
PB: predicated region body
PF: predicated region fallthrough
CT: control target
= control target key end

     0   :  { %17 = vsyncpa [#allocation3], 0  ;;  %vm52_vm0 = vcmask 261120   ;;  %s766_s0 = inlined_call_operand.vmem [shape: f32[8,32], index: 0, kind: input, shape index: {}]   ;;  %s767_s1 = inlined_call_operand.vmem [shape: f32[1,32], index: 1, kind: input, shape index: {}]   ;;  %s768_s2 = inlined_call_operand.vmem [shape: f32[1,32], index: 2, kind: input, shape index: {}]   ;;  %s769_s3 = inlined_call_operand.vmem [shape: f32[32,16], index: 3, kind: input, shape index: {}]   ;;  %s770_s4 = inlined_call_operand.vmem [shape: f32[1,16], index: 4, kind: input, shape index: {}]   ;;  %s771_s5 = inlined_call_operand.vmem [shape: f32[1,16], index: 5, kind: input, shape index: {}]   ;;  %s772_s6 = inlined_call_operand.vmem [shape: f32[1,16], index: 6, kind: input, shape index: {}]   ;;  %s773_s7 = inlined_call_operand.vmem [shape: f32[16,32], index: 7, kind: input, shape index: {}]   ;;  %s774_s8 = inlined_call_operand.vmem [shape: f32[1,32], index: 8, kind: input, shape index: {}]   ;;  %s775_s9 = inlined_call_operand.vmem [shape: f32[8,5,32], index: 9, kind: input, shape index: {}]   ;;  %s776_s10 = inlined_call_operand.hbm [shape: f32[8,32], index: 10, kind: output, shape index: {0}]   ;;  %s777_s11 = inlined_call_operand.hbm [shape: f32[8,5], index: 11, kind: output, shape index: {1}]  }
   0x1   :  { %v39_v0 = vld [vmem:[%s766_s0] sm:$0xff] }
   0x2   :  { %v53_v1 = vsel %vm52_vm0, %v39_v0, 0.0 }
   0x3   :  { %54 = vadd.xlane.f32.xlu0 %v53_v1 }
   0x4   :  { %18 = vsyncpa [#allocation5], 0  ;;  %v551_v2 = vmov 32.0   ;;  %v45_v14 = vld [vmem:[%s769_s3 + $0x18] sm:$0xff]  ;;  %v44_v15 = vld [vmem:[%s769_s3 + $0x10] sm:$0xff]  ;;  %vm116_vm5 = vcmask 130048  }
   0x5   :  { %491 = vrcp.f32 %v551_v2  ;;  %108 = vmatpush.msra.mxu0 %v45_v14  ;;  %v43_v16 = vld [vmem:[%s769_s3 + $0x8] sm:$0xff]  ;;  %v42_v17 = vld [vmem:[%s769_s3] sm:$0xff]  ;;  %v552_v37 = vmov 16.0   ;;  %s444_s29 = sshll.u32 %s776_s10, 4  ;;  %s560_s30 = smov [#allocation2]   ;;  %s445_s29 = int_to_ptr.hbm [resolvable:$true] %s444_s29 }
   0x6   :  { %v485_v27 = vld [vmem:[%s767_s1] ss:$0 sm:$0xff]  ;;  %v50_v49 = vld [vmem:[%s773_s7 + $0x8] sm:$0xff]  ;;  %s442_s1 = sshll.u32 %s560_s30, 4  ;;  %s455_s14 = sshll.u32 %s777_s11, 4  ;;  %s443_s1 = int_to_ptr.vmem [resolvable:$true] %s442_s1  ;;  %s456_s14 = int_to_ptr.hbm [resolvable:$true] %s455_s14 }
   0x7   :  { %109 = vmatpush.msra.mxu0 %v44_v15  ;;  %v486_v30 = vld [vmem:[%s768_s2] ss:$0 sm:$0xff]  ;;  %174 = vmatpush.msra.mxu1 %v50_v49 }
   0x8   :  { %v487_v33 = vld [vmem:[%s770_s4] ss:$0 sm:$0xff] }
   0x9   :  { %110 = vmatpush.msra.mxu0 %v43_v16  ;;  %v49_v50 = vld [vmem:[%s773_s7] sm:$0xff]  ;;  %v553_v16 = vmov 683565275  }
   0xa   :  { %175 = vmatpush.msra.mxu1 %v49_v50  ;;  %v488_v60 = vld [vmem:[%s771_s5] ss:$0 sm:$0xff] }
   0xb   :  { %v492_v3 = vpop.eup %491  ;;  %111 = vmatpush.msra.mxu0 %v42_v17  ;;  %v489_v63 = vld [vmem:[%s772_s6] ss:$0 sm:$0xff] }
   0xc   :  { %v57_v4 = vmul.f32 32.0, %v492_v3  ;;  %vm61_vm1 = vweird.f32 %v492_v3  ;;  %v490_v2 = vld [vmem:[%s774_s8] ss:$0 sm:$0xff] }
   0xe   :  { %v58_v5 = vsub.f32 1.0, %v57_v4 }
  0x10   :  { %v59_v6 = vmul.f32 %v492_v3, %v58_v5 }
  0x12   :  { %v60_v7 = vadd.f32 %v492_v3, %v59_v6 }
  0x14   :  { %v62_v8 = vsel %vm61_vm1, %v492_v3, %v60_v7 }
  0x76   :  { %v55_v9 = vpop.xlane.xlu0 %54 }
  0x77   :  { %v63_v10 = vmul.f32 %v62_v8, %v55_v9 }
  0x79   :  { %v64_v11 = vsub.f32 %v39_v0, %v63_v10 }
  0x7b   :  { %v65_v12 = vmul.f32 %v64_v11, %v64_v11 }
  0x7d   :  { %v66_v13 = vsel %vm52_vm0, %v65_v12, 0.0 }
  0x7e   :  { %67 = vadd.xlane.f32.xlu0 %v66_v13 }
  0xf1   :  { %v68_v18 = vpop.xlane.xlu0 %67 }
  0xf2   :  { %v69_v19 = vmul.f32 %v68_v18, %v62_v8  ;;  %v554_v18 = vmov 2475754826  }
  0xf4   :  { %v70_v20 = vadd.f32 1e-05, %v69_v19 }
  0xf6   :  { %493 = vrsqrt.f32 %v70_v20  ;;  %vm77_vm3 = vweird.f32 %v70_v20 }
  0xf7   :  { %495 = vrcp.f32 %v552_v37 }
  0xfc   :  { %v494_v21 = vpop.eup %493 }
  0xfd   :  { %v72_v22 = vmul.f32 %v494_v21, %v70_v20  ;;  %vm78_vm2 = vweird.f32 %v494_v21  ;;  %v496_v38 = vpop.eup %495 }
  0xfe   :  { %vm79_vm4 = vmor %vm77_vm3, %vm78_vm2  ;;  %v121_v39 = vmul.f32 16.0, %v496_v38  ;;  %vm125_vm6 = vweird.f32 %v496_v38 }
  0xff   :  { %v73_v23 = vmul.f32 %v494_v21, %v72_v22 }
 0x100   :  { %v122_v40 = vsub.f32 1.0, %v121_v39 }
 0x101   :  { %v74_v24 = vmul.f32 0.5, %v73_v23 }
 0x102   :  { %v123_v41 = vmul.f32 %v496_v38, %v122_v40 }
 0x103   :  { %v75_v25 = vsub.f32 1.5, %v74_v24  ;;  %v556_v24 = vmov 2102212464  }
 0x104   :  { %v124_v42 = vadd.f32 %v496_v38, %v123_v41 }
 0x105   :  { %v76_v26 = vmul.f32 %v494_v21, %v75_v25 }
 0x106   :  { %v126_v43 = vsel %vm125_vm6, %v496_v38, %v124_v42 }
 0x107   :  { %v80_v28 = vsel %vm79_vm4, %v494_v21, %v76_v26  ;;  %v555_v21 = vmov 2131351028  }
 0x108   :  { %v81_v29 = vmul.f32 %v80_v28, %v64_v11 }
 0x10a   :  { %v85_v31 = vmul.f32 %v485_v27, %v81_v29  ;;  %v557_v27 = vmov 920167782  }
 0x10c   :  { %v645_v32 = vadd.f32 %v486_v30, %v85_v31  ;;  %v558_v30 = vmov 1326507024  }
 0x10e   :  { %469 = vmatmul.msk.f32.vlgmr.msra.gmra.mxu0 %vm52_vm0, %v645_v32 }
 0x18b   :  { %v113_v34 = vpop.f32.mrf.mxu0 }
 0x18c   :  { %v114_v35 = vadd.f32 %v487_v33, %v113_v34 }
 0x18e   :  { %v117_v36 = vsel %vm116_vm5, %v114_v35, 0.0 }
 0x18f   :  { %118 = vadd.xlane.f32.xlu1 %v117_v36 }
 0x202   :  { %v119_v44 = vpop.xlane.xlu1 %118 }
 0x203   :  { %v127_v45 = vmul.f32 %v126_v43, %v119_v44 }
 0x205   :  { %v128_v46 = vsub.f32 %v114_v35, %v127_v45 }
 0x207   :  { %v129_v47 = vmul.f32 %v128_v46, %v128_v46 }
 0x209   :  { %v130_v48 = vsel %vm116_vm5, %v129_v47, 0.0 }
 0x20a   :  { %131 = vadd.xlane.f32.xlu1 %v130_v48 }
 0x27d   :  { %v132_v51 = vpop.xlane.xlu1 %131 }
 0x27e   :  { %v133_v52 = vmul.f32 %v132_v51, %v126_v43 }
 0x280   :  { %v134_v53 = vadd.f32 1e-05, %v133_v52 }
 0x282   :  { %497 = vrsqrt.f32 %v134_v53  ;;  %vm141_vm8 = vweird.f32 %v134_v53 }
 0x288   :  { %v498_v54 = vpop.eup %497 }
 0x289   :  { %v136_v55 = vmul.f32 %v498_v54, %v134_v53  ;;  %vm142_vm7 = vweird.f32 %v498_v54 }
 0x28a   :  { %vm143_vm9 = vmor %vm141_vm8, %vm142_vm7 }
 0x28b   :  { %v137_v56 = vmul.f32 %v498_v54, %v136_v55 }
 0x28d   :  { %v138_v57 = vmul.f32 0.5, %v137_v56 }
 0x28f   :  { %v139_v58 = vsub.f32 1.5, %v138_v57 }
 0x291   :  { %v140_v59 = vmul.f32 %v498_v54, %v139_v58 }
 0x293   :  { %v144_v61 = vsel %vm143_vm9, %v498_v54, %v140_v59 }
 0x294   :  { %v145_v62 = vmul.f32 %v144_v61, %v128_v46 }
 0x296   :  { %v149_v0 = vmul.f32 %v488_v60, %v145_v62 }
 0x298   :  { %v153_v1 = vadd.f32 %v489_v63, %v149_v0 }
 0x29a   :  { %470 = vmatmul.msk.f32.vlgmr.msra.gmra.mxu1 %vm116_vm5, %v153_v1  ;;  %v559_v1 = vmov 0  }
 0x317   :  { %v177_v3 = vpop.f32.mrf.mxu1 }
 0x318   :  { %v670_v4 = vadd.f32 %v490_v2, %v177_v3 }
 0x31a   :  { %v183_v5 = vand.u32 2139095040, %v670_v4  ;;  %v180_v8 = vand.u32 2147483647, %v670_v4  ;;  %vm182_vm7 = vcmp.lt.s32.totalorder %v670_v4, 0 }
 0x31c   :  { %v184_v6 = vshrl.u32 %v183_v5, 23  ;;  %v187_v10 = vand.u32 8388607, %v180_v8  ;;  %vm181_vm8 = vcmp.le.f32.partialorder %v180_v8, 0.7853982 }
 0x31e   :  { %v471_v7 = vadd.s32 4294967169, %v184_v6  ;;  %v188_v14 = vor.u32 8388608, %v187_v10 }
 0x320   :  { %v190_v9 = vadd.s32 1, %v471_v7  ;;  %v687_v38 = vshll.u32 %v188_v14, 8 }
 0x322   :  { %vm191_vm10 = vcmp.gt.s32.totalorder %v190_v9, 0  ;;  %v229_v47 = vand.u32 65535, %v687_v38  ;;  %v230_v48 = vshrl.u32 %v687_v38, 16 }
 0x323   :  { %v192_v11 = vsel %vm191_vm10, %v190_v9, 0 }
 0x324   :  { %v194_v12 = vand.u32 31, %v192_v11  ;;  %v678_v15 = vshrl.u32 %v192_v11, 5 }
 0x326   :  { %v676_v13 = vsub.s32 32, %v194_v12  ;;  %v197_v17 = vshll.u32 %v553_v16, %v194_v12  ;;  %v200_v19 = vshll.u32 %v554_v18, %v194_v12  ;;  %v203_v23 = vshll.u32 %v555_v21, %v194_v12 }
 0x327   :  { %v206_v26 = vshll.u32 %v556_v24, %v194_v12  ;;  %v209_v29 = vshll.u32 %v557_v27, %v194_v12  ;;  %vm212_vm11 = vcmp.lt.s32.totalorder %v678_v15, 1  ;;  %vm215_vm12 = vcmp.lt.s32.totalorder %v678_v15, 4 }
 0x328   :  { %v198_v20 = vshrl.u32 %v554_v18, %v676_v13  ;;  %v201_v22 = vshrl.u32 %v555_v21, %v676_v13  ;;  %v204_v25 = vshrl.u32 %v556_v24, %v676_v13  ;;  %v207_v28 = vshrl.u32 %v557_v27, %v676_v13 }
 0x329   :  { %v210_v31 = vshrl.u32 %v558_v30, %v676_v13  ;;  %vm214_vm13 = vcmp.lt.s32.totalorder %v678_v15, 3  ;;  %vm213_vm14 = vcmp.lt.s32.totalorder %v678_v15, 2  ;;  %v196_v12 = vshrl.u32 %v553_v16, %v676_v13 }
 0x32a   :  { %v199_v33 = vor.u32 %v198_v20, %v197_v17  ;;  %v202_v34 = vor.u32 %v201_v22, %v200_v19  ;;  %v205_v35 = vor.u32 %v204_v25, %v203_v23  ;;  %v208_v36 = vor.u32 %v207_v28, %v206_v26 }
 0x32b   :  { %v211_v37 = vor.u32 %v210_v31, %v209_v29 }
 0x32c   :  { %v220_v39 = vsel %vm212_vm11, %v199_v33, %v202_v34  ;;  %v224_v40 = vsel %vm212_vm11, %v202_v34, %v205_v35  ;;  %v221_v41 = vsel %vm215_vm12, %v208_v36, 920167782  ;;  %v217_v9 = vsel %vm215_vm12, %v205_v35, 2102212464 }
 0x32d   :  { %v225_v42 = vsel %vm215_vm12, %v211_v37, 1326507024  ;;  %v222_v43 = vsel %vm214_vm13, %v205_v35, %v221_v41  ;;  %v216_v21 = vsel %vm212_vm11, %v196_v12, %v199_v33  ;;  %v218_v22 = vsel %vm214_vm13, %v202_v34, %v217_v9 }
 0x32e   :  { %v226_v44 = vsel %vm214_vm13, %v208_v36, %v225_v42  ;;  %v223_v45 = vsel %vm213_vm14, %v220_v39, %v222_v43  ;;  %v219_v13 = vsel %vm213_vm14, %v216_v21, %v218_v22  ;;  %vm323_vm12 = vweird.f32 %v670_v4 }
 0x32f   :  { %v227_v46 = vsel %vm213_vm14, %v224_v40, %v226_v44  ;;  %v253_v51 = vand.u32 65535, %v223_v45  ;;  %v254_v52 = vshrl.u32 %v223_v45, 16  ;;  %v273_v30 = vmul.u32 %v687_v38, %v219_v13 }
 0x330   :  { %v231_v49 = vand.u32 65535, %v227_v46  ;;  %v232_v50 = vshrl.u32 %v227_v46, 16  ;;  %vm377_vm13 = vcmask 258048   ;;  %vm422_vm14 = vcmask 1042434  }
 0x331   :  { %v256_v55 = vmul.u32 %v254_v52, %v229_v47  ;;  %v257_v56 = vmul.u32 %v253_v51, %v230_v48  ;;  %v255_v60 = vmul.u32 %v253_v51, %v229_v47  ;;  %v258_v0 = vmul.u32 %v254_v52, %v230_v48 }
 0x332   :  { %v234_v53 = vmul.u32 %v232_v50, %v229_v47  ;;  %v235_v54 = vmul.u32 %v231_v49, %v230_v48  ;;  %v233_v57 = vmul.u32 %v231_v49, %v229_v47  ;;  %v236_v59 = vmul.u32 %v232_v50, %v230_v48 }
 0x333   :  { %v259_v61 = vshll.u32 %v256_v55, 16  ;;  %v261_v3 = vshll.u32 %v257_v56, 16  ;;  %v260_v19 = vshrl.u32 %v256_v55, 16  ;;  %v262_v25 = vshrl.u32 %v257_v56, 16 }
 0x334   :  { %v237_v58 = vshll.u32 %v234_v53, 16  ;;  %v239_v62 = vshll.u32 %v235_v54, 16  ;;  %v238_v14 = vshrl.u32 %v234_v53, 16  ;;  %v240_v23 = vshrl.u32 %v235_v54, 16 }
 0x335   :  { %vm263_vm1 = vc.u32 %v255_v60, %v259_v61  ;;  %v265_v5 = vadd.s32 %v259_v61, %v255_v60 }
 0x336   :  { %vm241_vm15 = vc.u32 %v233_v57, %v237_v58  ;;  %v243_v63 = vadd.s32 %v237_v58, %v233_v57  ;;  %v264_v7 = vsel %vm263_vm1, 1, %v559_v1  ;;  %vm426_vm1 = vcmask 1044484  }
 0x337   :  { %v242_v2 = vsel %vm241_vm15, 1, %v559_v1  ;;  %v266_v11 = vadd.s32 %v264_v7, %v258_v0  ;;  %vm267_vm3 = vc.u32 %v265_v5, %v261_v3  ;;  %v269_v28 = vadd.s32 %v265_v5, %v261_v3 }
 0x338   :  { %v244_v6 = vadd.s32 %v242_v2, %v236_v59  ;;  %vm245_vm2 = vc.u32 %v243_v63, %v239_v62  ;;  %v268_v18 = vsel %vm267_vm3, 1, %v559_v1  ;;  %vm424_vm15 = vcmask 1043459  }
 0x339   :  { %v246_v10 = vsel %vm245_vm2, 1, %v559_v1  ;;  %v270_v20 = vadd.s32 %v268_v18, %v266_v11  ;;  %vm428_vm2 = vcmask 1045509   ;;  %vm430_vm3 = vcmask 1046534  }
 0x33a   :  { %v248_v17 = vadd.s32 %v246_v10, %v244_v6 }
 0x33b   :  { %v271_v26 = vadd.s32 %v270_v20, %v260_v19 }
 0x33c   :  { %v249_v24 = vadd.s32 %v248_v17, %v238_v14 }
 0x33d   :  { %v272_v16 = vadd.s32 %v271_v26, %v262_v25 }
 0x33e   :  { %v250_v27 = vadd.s32 %v249_v24, %v240_v23  ;;  %v337_v23 = vld [vmem:[%s775_s9] sm:$0x1f] }
 0x33f   :  { %v276_v29 = vadd.s32 1, %v272_v16 }
 0x340   :  { %vm275_vm4 = vc.u32 %v250_v27, %v269_v28  ;;  %v274_v15 = vadd.s32 %v269_v28, %v250_v27  ;;  %v340_v28 = vld [vmem:[%s775_s9 + $0x18] sm:$0x1f] }
 0x341   :  { %v277_v31 = vsel %vm275_vm4, %v276_v29, %v272_v16  ;;  %vm432_vm4 = vcmask 1047559  }
 0x342   :  { %v278_v35 = vadd.s32 %v277_v31, %v273_v30 }
 0x344   :  { %v279_v33 = vadd.s32 536870912, %v278_v35 }
 0x346   :  { %v280_v36 = vshrl.u32 %v279_v33, 30 }
 0x348   :  { %v281_v37 = vshll.u32 %v280_v36, 30  ;;  %v304_v56 = vsub.s32 4, %v280_v36 }
 0x34a   :  { %v282_v34 = vsub.s32 %v278_v35, %v281_v37  ;;  %v305_v61 = vsel %vm182_vm7, %v304_v56, %v280_v36  ;;  %v338_v37 = vld [vmem:[%s775_s9 + $0x8] sm:$0x1f] }
 0x34b   :  { %v307_v0 = vsel %vm181_vm8, 0, %v305_v61 }
 0x34c   :  { %vm283_vm5 = vcmp.lt.s32.totalorder %v282_v34, 0  ;;  %v284_v39 = vsub.s32 0, %v282_v34  ;;  %v324_v6 = vadd.s32 3, %v307_v0 }
 0x34e   :  { %v285_v40 = vsel %vm283_vm5, %v284_v39, %v282_v34  ;;  %v325_v11 = vand.u32 3, %v324_v6  ;;  %vm435_vm5 = vcmask 39936  }
 0x34f   :  { %v286_v41 = vclz %v285_v40 }
 0x350   :  { %vm327_vm9 = vcmp.eq.s32.totalorder %v325_v11, 0  ;;  %vm330_vm10 = vcmp.eq.s32.totalorder %v325_v11, 2  ;;  %vm326_vm11 = vcmp.lt.s32.totalorder %v325_v11, 2 }
 0x351   :  { %v472_v42 = vadd.s32 4294967294, %v286_v41 }
 0x353   :  { %vm473_vm6 = vcmp.lt.s32.totalorder %v472_v42, 0 }
 0x354   :  { %v289_v43 = vsel %vm473_vm6, 0, %v472_v42  ;;  %v343_v42 = vld [vmem:[%s775_s9 + $0x30] sm:$0x1f] }
 0x355   :  { %v290_v44 = vsub.s32 32, %v289_v43  ;;  %v294_v45 = vsub.s32 4294967266, %v289_v43  ;;  %v291_v46 = vshll.u32 %v282_v34, %v289_v43  ;;  %v342_v43 = vld [vmem:[%s775_s9 + $0x28] sm:$0x1f] }
 0x357   :  { %v292_v47 = vshrl.u32 %v274_v15, %v290_v44  ;;  %v295_v48 = vadd.s32 127, %v294_v45 }
 0x359   :  { %v293_v38 = vor.u32 %v292_v47, %v291_v46  ;;  %v296_v49 = vshll.u32 %v295_v48, 23 }
 0x35b   :  { %v297_v50 = vor.u32 4788187, %v296_v49  ;;  %v300_v52 = vcvt.s32.f32 %v293_v38  ;;  %v341_v38 = vld [vmem:[%s775_s9 + $0x20] sm:$0x1f] }
 0x35d   :  { %v298_v51 = vand.u32 2147483647, %v297_v50 }
 0x35f   :  { %v301_v53 = vmul.f32 %v300_v52, %v298_v51 }
 0x361   :  { %v302_v54 = vxor.u32 2147483648, %v301_v53 }
 0x363   :  { %v303_v55 = vsel %vm182_vm7, %v302_v54, %v301_v53 }
 0x364   :  { %v306_v57 = vsel %vm181_vm8, %v670_v4, %v303_v55  ;;  %v339_v4 = vld [vmem:[%s775_s9 + $0x10] sm:$0x1f]  ;;  %v344_v55 = vld [vmem:[%s775_s9 + $0x38] sm:$0x1f]  ;;  %s561_s9 = smov [#allocation4]  }
 0x365   :  { %v308_v58 = vmul.f32 %v306_v57, %v306_v57  ;;  %s453_s10 = sshll.u32 %s561_s9, 4  ;;  %s454_s10 = int_to_ptr.vmem [resolvable:$true] %s453_s10 }
 0x367   :  { %v309_v59 = vmul.f32 -0.001358992, %v308_v58  ;;  %v316_v60 = vmul.f32 -0.00019511016, %v308_v58 }
 0x369   :  { %v310_v62 = vadd.f32 0.041655596, %v309_v59  ;;  %v317_v63 = vadd.f32 0.008332121, %v316_v60  ;;  %v410_v59 = vlaneseq }
 0x36b   :  { %v311_v1 = vmul.f32 %v310_v62, %v308_v58  ;;  %v318_v2 = vmul.f32 %v317_v63, %v308_v58  ;;  %v411_v60 = vand.u32 127, %v410_v59 }
 0x36d   :  { %v312_v3 = vadd.f32 -0.4999988, %v311_v1  ;;  %v319_v5 = vadd.f32 -0.16666654, %v318_v2 }
 0x36f   :  { %v313_v7 = vmul.f32 %v312_v3, %v308_v58  ;;  %v320_v9 = vmul.f32 %v319_v5, %v308_v58 }
 0x371   :  { %v314_v10 = vadd.f32 1.0, %v313_v7  ;;  %v321_v8 = vadd.f32 1.0, %v320_v9 }
 0x373   :  { %v322_v12 = vmul.f32 %v321_v8, %v306_v57  ;;  %v331_v14 = vxor.u32 2147483648, %v314_v10 }
 0x375   :  { %v328_v17 = vxor.u32 2147483648, %v322_v12  ;;  %v332_v19 = vsel %vm330_vm10, %v331_v14, %v322_v12 }
 0x377   :  { %v329_v18 = vsel %vm327_vm9, %v314_v10, %v328_v17 }
 0x378   :  { %v333_v20 = vsel %vm326_vm11, %v329_v18, %v332_v19 }
 0x379   :  { %v334_v21 = vsel %vm323_vm12, nan, %v333_v20 }
 0x37a   :  { %v335_v22 = vadd.f32 %v334_v21, %v645_v32 }
 0x37c   :  { %336 = vst.msk [vmem:[#allocation2] sm:$0xff] %vm52_vm0, %v335_v22  ;;  %v353_v24 = vperm.slane %v335_v22, 0  ;;  %v348_v25 = vrot.slane %v335_v22, 3  ;;  %v347_v26 = vrot.slane %v335_v22, 2  ;;  %v346_v27 = vrot.slane %v335_v22, 1 }
 0x37d   :  { %v351_v32 = vrot.slane %v335_v22, 6  ;;  %v350_v30 = vrot.slane %v335_v22, 5  ;;  %v349_v44 = vrot.slane %v335_v22, 4  ;;  %v352_v52 = vrot.slane %v335_v22, 7  ;;  %447 = dma.vmem_to_hbm [thread:$0]  %s443_s1, 128, %s445_s29, [#allocation3]  }
 0x37e   :  { %v369_v13 = vmul.f32 %v353_v24, %v337_v23  ;;  %v356_v16 = vperm.slane %v348_v25, 0  ;;  %v355_v29 = vperm.slane %v347_v26, 0  ;;  %v354_v36 = vperm.slane %v346_v27, 0 }
 0x37f   :  { %v359_v40 = vperm.slane %v351_v32, 0  ;;  %v358_v41 = vperm.slane %v350_v30, 0  ;;  %v357_v48 = vperm.slane %v349_v44, 0  ;;  %v360_v54 = vperm.slane %v352_v52, 0 }
 0x380   :  { %v378_v31 = vsel %vm377_vm13, %v369_v13, 0.0  ;;  %v372_v35 = vmul.f32 %v356_v16, %v340_v28  ;;  %v371_v33 = vmul.f32 %v355_v29, %v339_v4  ;;  %v370_v15 = vmul.f32 %v354_v36, %v338_v37 }
 0x381   :  { %379 = vadd.xlane.f32.xlu2 %v378_v31  ;;  %v375_v45 = vmul.f32 %v359_v40, %v343_v42  ;;  %v374_v46 = vmul.f32 %v358_v41, %v342_v43  ;;  %v373_v51 = vmul.f32 %v357_v48, %v341_v38  ;;  %v376_v56 = vmul.f32 %v360_v54, %v344_v55 }
 0x382   :  { %v387_v34 = vsel %vm377_vm13, %v372_v35, 0.0  ;;  %v384_v39 = vsel %vm377_vm13, %v371_v33, 0.0  ;;  %v381_v47 = vsel %vm377_vm13, %v370_v15, 0.0  ;;  %vm420_vm0 = vcmask 1041409  }
 0x383   :  { %388 = vadd.xlane.f32.xlu1 %v387_v34  ;;  %385 = vadd.xlane.f32.xlu0 %v384_v39  ;;  %v396_v49 = vsel %vm377_vm13, %v375_v45, 0.0  ;;  %v393_v50 = vsel %vm377_vm13, %v374_v46, 0.0  ;;  %v390_v53 = vsel %vm377_vm13, %v373_v51, 0.0  ;;  %v399_v57 = vsel %vm377_vm13, %v376_v56, 0.0 }
 0x389   :  { %382 = vadd.xlane.f32.xlu2 %v381_v47 }
 0x38b   :  { %397 = vadd.xlane.f32.xlu1 %v396_v49  ;;  %394 = vadd.xlane.f32.xlu0 %v393_v50 }
 0x391   :  { %391 = vadd.xlane.f32.xlu2 %v390_v53 }
 0x399   :  { %400 = vadd.xlane.f32.xlu2 %v399_v57 }
 0x3f4   :  { %v380_v58 = vpop.xlane.xlu2 %379 }
 0x3f5   :  { %v412_v0 = vperm.slane %v380_v58, %v411_v60 }
 0x3f6   :  { %v386_v61 = vpop.xlane.xlu0 %385  ;;  %v389_v1 = vpop.xlane.xlu1 %388 }
 0x3f7   :  { %v414_v3 = vperm.slane %v386_v61, %v411_v60  ;;  %v415_v7 = vperm.slane %v389_v1, %v411_v60 }
 0x3fc   :  { %v383_v62 = vpop.xlane.xlu2 %382 }
 0x3fd   :  { %v413_v63 = vperm.slane %v383_v62, %v411_v60 }
 0x3fe   :  { %v395_v10 = vpop.xlane.xlu0 %394  ;;  %v398_v12 = vpop.xlane.xlu1 %397 }
 0x3ff   :  { %v421_v2 = vsel %vm420_vm0, %v413_v63, %v412_v0  ;;  %v417_v14 = vperm.slane %v395_v10, %v411_v60  ;;  %v418_v18 = vperm.slane %v398_v12, %v411_v60 }
 0x400   :  { %v423_v5 = vsel %vm422_vm14, %v414_v3, %v421_v2 }
 0x401   :  { %v425_v8 = vsel %vm424_vm15, %v415_v7, %v423_v5 }
 0x404   :  { %v392_v6 = vpop.xlane.xlu2 %391 }
 0x405   :  { %v416_v9 = vperm.slane %v392_v6, %v411_v60 }
 0x407   :  { %v427_v11 = vsel %vm426_vm1, %v416_v9, %v425_v8 }
 0x408   :  { %v429_v17 = vsel %vm428_vm2, %v417_v14, %v427_v11 }
 0x409   :  { %v431_v21 = vsel %vm430_vm3, %v418_v18, %v429_v17 }
 0x40c   :  { %v401_v19 = vpop.xlane.xlu2 %400 }
 0x40d   :  { %v419_v20 = vperm.slane %v401_v19, %v411_v60 }
 0x40f   :  { %v433_v22 = vsel %vm432_vm4, %v419_v20, %v431_v21 }
 0x410   :  { %436 = vst.msk [vmem:[#allocation4] sm:$0xff] %vm435_vm5, %v433_v22 }
 0x411   :  { %458 = dma.vmem_to_hbm [thread:$0]  %s454_s10, 128, %s456_s14, [#allocation5]  }
 0x412   :  { %547 = dma.done.wait [#allocation3], 128  }
 0x413   :  { %548 = vsyncadd [#allocation3], 4294967168 }
 0x414   :  { %549 = dma.done.wait [#allocation5], 128  }
 0x415   :  { %550 = vsyncadd [#allocation5], 4294967168 }
 0x416   :  { %467 = vsyncpa [#allocation3], 1 }
 0x417   :  { %468 = vsyncpa [#allocation5], 1 }

</bundles_post_ra>
